<compile_context>
chip_gen: v7x
topology: tpu7x:2x2x1
jax: 0.10.0
libtpu: 0.0.40
codegen_flags: <defaults>
</compile_context>

<pallas_src>
import jax
import jax.numpy as jnp
from jax.experimental import pallas as pl
from jax.experimental.pallas import tpu as pltpu


# ----------------------------- Pallas kernel ------------------------------ #
def _complex_conv_kernel(p_ref, w_ref, b_ref, o_ref):
    """One fused MXU contraction producing [real | imag] output channels.

    p_ref: (tm, Kpad) bf16  im2col patches of [real ++ imag] input channels
    w_ref: (Kpad, C2) bf16  stacked weight [[wr | wi], [-wi | wr]] (zero-pad rows)
    b_ref: (1, C2)    f32   folded bias    [br - bi | br + bi]
    o_ref: (tm, C2)   f32   [out_real | out_imag]
    """
    acc = jnp.dot(p_ref[...], w_ref[...], preferred_element_type=jnp.float32)
    o_ref[...] = (acc + b_ref[...]).astype(o_ref.dtype)


def _choose_tm(M, Kpad, C2, vmem_budget):
    # Per-step footprint: double-buffered patch (bf16) + output (f32) blocks,
    # plus the revolving (but only-DMA'd-once) weight / bias blocks.
    fixed = 2 * (Kpad * C2 * 2 + C2 * 4)
    per_row = 2 * (Kpad * 2) + 2 * (C2 * 4)
    tm = max(16, (vmem_budget - fixed) // max(per_row, 1))
    tm = min(tm, 2048)                      # diminishing returns past this
    tm = min(tm, max(16, -(-M // 4)))       # >= 4 M-steps when M allows
    tm = max(16, (tm // 16) * 16)           # bf16 sublane pack
    return tm, fixed + per_row * tm


def _pallas_complex_matmul(patches, w_fused, bias):
    """patches (M,Kpad) bf16 @ w_fused (Kpad,C2) bf16 + bias (1,C2) f32 -> (M,C2) f32."""
    M, Kpad = patches.shape
    C2 = w_fused.shape[1]

    tm, footprint = _choose_tm(M, Kpad, C2, vmem_budget=32 * 1024 * 1024)
    vmem_limit = int(min(40 * 1024 * 1024, max(4 * footprint, 16 * 1024 * 1024)))

    grid = (pl.cdiv(M, tm),)
    patch_spec = pl.BlockSpec((tm, Kpad), lambda i: (i, 0))
    w_spec = pl.BlockSpec((Kpad, C2), lambda i: (0, 0))
    b_spec = pl.BlockSpec((1, C2), lambda i: (0, 0))
    out_spec = pl.BlockSpec((tm, C2), lambda i: (i, 0))

    return pl.pallas_call(
        _complex_conv_kernel,
        out_shape=jax.ShapeDtypeStruct((M, C2), jnp.float32),
        grid_spec=pltpu.PrefetchScalarGridSpec(
            num_scalar_prefetch=0,
            grid=grid,
            in_specs=[patch_spec, w_spec, b_spec],
            out_specs=out_spec,
        ),
        compiler_params=pltpu.CompilerParams(
            dimension_semantics=("parallel",),
            vmem_limit_bytes=vmem_limit,
        ),
    )(patches, w_fused, bias)


# ------------------------------- JAX glue --------------------------------- #
def _im2col(x, kh, kw, stride, padding):
    """x: (N, C, H, W) -> patches (N*Ho*Wo, C*kh*kw), plus (Ho, Wo)."""
    N, C, H, W = x.shape
    xp = jnp.pad(x, ((0, 0), (0, 0), (padding, padding), (padding, padding)))
    Ho = (H + 2 * padding - kh) // stride + 1
    Wo = (W + 2 * padding - kw) // stride + 1
    cols = []
    for i in range(kh):
        for j in range(kw):
            cols.append(xp[:, :, i:i + stride * Ho:stride,
                           j:j + stride * Wo:stride])
    p = jnp.stack(cols, axis=2)                       # (N, C, kh*kw, Ho, Wo)
    p = p.transpose(0, 3, 4, 1, 2).reshape(N * Ho * Wo, C * kh * kw)
    return p, Ho, Wo


class ComplexConv2dPallas:
    """Mirrors torch ComplexConv2d: two Conv2d layers, complex combine."""

    def __init__(self, in_channels, out_channels, kernel_size, stride=1,
                 padding=0, *, key=None, compute_dtype=jnp.bfloat16):
        self.in_channels = in_channels
        self.out_channels = out_channels
        self.kh = self.kw = kernel_size
        self.stride = stride
        self.padding = padding
        self.compute_dtype = compute_dtype

        if key is None:
            key = jax.random.PRNGKey(0)
        k1, k2, k3, k4 = jax.random.split(key, 4)
        fan_in = in_channels * kernel_size * kernel_size
        bound = 1.0 / jnp.sqrt(fan_in)
        wshape = (out_channels, in_channels, kernel_size, kernel_size)
        # Deterministic init (PyTorch-like uniform bounds), stored in f32.
        self.w_real = jax.random.uniform(k1, wshape, jnp.float32, -bound, bound)
        self.w_imag = jax.random.uniform(k2, wshape, jnp.float32, -bound, bound)
        self.b_real = jax.random.uniform(k3, (out_channels,), jnp.float32, -bound, bound)
        self.b_imag = jax.random.uniform(k4, (out_channels,), jnp.float32, -bound, bound)

        # ---- precompute fused stacked weight + folded bias ----
        K = in_channels * kernel_size * kernel_size   # per complex component
        K2 = 2 * K
        self.K = K
        self.k_pad = ((K2 + 127) // 128) * 128         # lane-aligned contraction
        Cout = out_channels
        C2 = 2 * Cout
        self.c2 = C2

        wr2 = self.w_real.reshape(Cout, K).T           # (K, Cout)
        wi2 = self.w_imag.reshape(Cout, K).T

        w = jnp.zeros((self.k_pad, C2), jnp.float32)
        w = w.at[:K, :Cout].set(wr2)                   # real patches -> out_real
        w = w.at[:K, Cout:].set(wi2)                   # real patches -> out_imag
        w = w.at[K:K2, :Cout].set(-wi2)                # imag patches -> out_real
        w = w.at[K:K2, Cout:].set(wr2)                 # imag patches -> out_imag
        self.w_fused = w.astype(compute_dtype)         # (Kpad, C2) bf16

        bias = jnp.zeros((1, C2), jnp.float32)
        bias = bias.at[0, :Cout].set(self.b_real - self.b_imag)
        bias = bias.at[0, Cout:].set(self.b_real + self.b_imag)
        self.bias_packed = bias                         # (1, C2) f32

        self._fwd = jax.jit(self._forward)

    def _forward(self, real, imag):
        cd = self.compute_dtype
        # Fuse real/imag along channels -> one patch stream, one MXU dot.
        x_c = jnp.concatenate([real, imag], axis=1).astype(cd)  # (N, 2*Cin, H, W)
        p, Ho, Wo = _im2col(x_c, self.kh, self.kw, self.stride, self.padding)
        if p.shape[1] != self.k_pad:                   # zero-pad contraction dim
            p = jnp.pad(p, ((0, 0), (0, self.k_pad - p.shape[1])))

        out = _pallas_complex_matmul(p, self.w_fused, self.bias_packed)  # (M, C2) f32

        N = real.shape[0]
        Cout = self.out_channels

        def back_to_nchw(o):
            # NCHW kept to match the PyTorch module's output convention.
            # TODO(synk): return NHWC directly when the consumer allows it, to
            # drop this extra XLA read+write pass.
            return o.reshape(N, Ho, Wo, Cout).transpose(0, 3, 1, 2)

        return back_to_nchw(out[:, :Cout]), back_to_nchw(out[:, Cout:])

    def __call__(self, x):
        real, imag = x                                  # each (N, C, H, W)
        return self._fwd(real, imag)


# ------------------------------ reference --------------------------------- #
def _conv_ref(x, w, b, stride, padding):
    out = jax.lax.conv_general_dilated(
        x, w, window_strides=(stride, stride),
        padding=[(padding, padding), (padding, padding)],
        dimension_numbers=("NCHW", "OIHW", "NCHW"),
        precision=jax.lax.Precision.HIGHEST)
    return out + b[None, :, None, None]


if __name__ == "__main__":
    key = jax.random.PRNGKey(0)
    k_mod, k_r, k_i = jax.random.split(key, 3)

    N, Cin, Cout, H, W = 2, 4, 8, 16, 16
    ksize, stride, padding = 3, 1, 1

    mod = ComplexConv2dPallas(Cin, Cout, ksize, stride, padding, key=k_mod)

    x_real = jax.random.normal(k_r, (N, Cin, H, W), jnp.float32)
    x_imag = jax.random.normal(k_i, (N, Cin, H, W), jnp.float32)

    out_real, out_imag = mod((x_real, x_imag))
    jax.block_until_ready((out_real, out_imag))

    # Reference with bf16-rounded operands (the kernel streams bf16 patches /
    # weights with f32 accumulation), bias kept in f32.
    def q(a):
        return a.astype(jnp.bfloat16).astype(jnp.float32)

    ref_rr = _conv_ref(q(x_real), q(mod.w_real), mod.b_real, stride, padding)
    ref_ii = _conv_ref(q(x_imag), q(mod.w_imag), mod.b_imag, stride, padding)
    ref_ri = _conv_ref(q(x_real), q(mod.w_imag), mod.b_imag, stride, padding)
    ref_ir = _conv_ref(q(x_imag), q(mod.w_real), mod.b_real, stride, padding)
    ref_real = ref_rr - ref_ii
    ref_imag = ref_ri + ref_ir

    assert out_real.shape == (N, Cout, H, W) and out_imag.shape == (N, Cout, H, W)
    assert jnp.allclose(out_real, ref_real, atol=2e-3, rtol=2e-3)
    assert jnp.allclose(out_imag, ref_imag, atol=2e-3, rtol=2e-3)

    print("KERNEL_OK")
</pallas_src>

<mosaic_0001>
module attributes {stable_mosaic.version = 11 : i64} {
  func.func @_complex_conv_kernel(%arg0: i32, %arg1: memref<128x128xbf16, #tpu.memory_space<vmem>>, %arg2: memref<128x16xbf16, #tpu.memory_space<vmem>>, %arg3: memref<1x16xf32, #tpu.memory_space<vmem>>, %arg4: memref<128x16xf32, #tpu.memory_space<vmem>>) attributes {dimension_semantics = [#tpu.dimension_semantics<parallel>], iteration_bounds = array<i64: 4>, scalar_prefetch = 0 : i64, scratch_operands = 0 : i64, tpu.core_type = #tpu.core_type<tc>, window_params = [{transform_indices = @transform_0, window_bounds = array<i64: 128, 128>}, {pipeline_mode = #tpu.pipeline_mode<synchronous>, transform_indices = @transform_1, window_bounds = array<i64: 128, 16>}, {pipeline_mode = #tpu.pipeline_mode<synchronous>, transform_indices = @transform_2, window_bounds = array<i64: 1, 16>}, {transform_indices = @transform_3, window_bounds = array<i64: 128, 16>}]} {
    %c0 = arith.constant 0 : index
    %c0_0 = arith.constant 0 : index
    %0 = vector.load %arg1[%c0, %c0_0] : memref<128x128xbf16, #tpu.memory_space<vmem>>, vector<128x128xbf16>
    %c0_1 = arith.constant 0 : index
    %c0_2 = arith.constant 0 : index
    %1 = vector.load %arg2[%c0_1, %c0_2] : memref<128x16xbf16, #tpu.memory_space<vmem>>, vector<128x16xbf16>
    %cst = arith.constant dense<0.000000e+00> : vector<128x16xf32>
    %2 = tpu.matmul %0, %1, %cst {dimension_numbers = #tpu.dot_dimension_numbers<[1], [0], [0], [1], [0, 0, 1, 1], [], []>} : vector<128x128xbf16>, vector<128x16xbf16>, vector<128x16xf32> -> vector<128x16xf32>
    %c0_3 = arith.constant 0 : index
    %c0_4 = arith.constant 0 : index
    %3 = vector.load %arg3[%c0_3, %c0_4] : memref<1x16xf32, #tpu.memory_space<vmem>>, vector<1x16xf32>
    %4 = vector.broadcast %3 : vector<1x16xf32> to vector<128x16xf32>
    %5 = arith.addf %2, %4 : vector<128x16xf32>
    %c0_5 = arith.constant 0 : index
    %c0_6 = arith.constant 0 : index
    %6 = vector.load %arg4[%c0_5, %c0_6] : memref<128x16xf32, #tpu.memory_space<vmem>>, vector<128x16xf32>
    tpu.vector_store %arg4[%c0_5, %c0_6], %5 {strides = array<i32>} : memref<128x16xf32, #tpu.memory_space<vmem>>, vector<128x16xf32>,
    return
  }
  func.func @transform_0(%arg0: i32) -> (i32, i32) {
    %c0_i32 = arith.constant 0 : i32
    %c0_i32_0 = arith.constant 0 : i32
    return %arg0, %c0_i32 : i32, i32
  }
  func.func @transform_1(%arg0: i32) -> (i32, i32) {
    %c0_i32 = arith.constant 0 : i32
    %c0_i32_0 = arith.constant 0 : i32
    %c0_i32_1 = arith.constant 0 : i32
    return %c0_i32, %c0_i32_0 : i32, i32
  }
  func.func @transform_2(%arg0: i32) -> (i32, i32) {
    %c0_i32 = arith.constant 0 : i32
    %c0_i32_0 = arith.constant 0 : i32
    %c0_i32_1 = arith.constant 0 : i32
    return %c0_i32, %c0_i32_0 : i32, i32
  }
  func.func @transform_3(%arg0: i32) -> (i32, i32) {
    %c0_i32 = arith.constant 0 : i32
    %c0_i32_0 = arith.constant 0 : i32
    return %arg0, %c0_i32 : i32, i32
  }
}

</mosaic_0001>

<bundles_post_ra>
// kernel: _forward.1
= control target key start
LH: loop header
LB: loop body
LE: loop exit
PB: predicated region body
PF: predicated region fallthrough
CT: control target
= control target key end

     0   :  { %s624_s12 = smov 0   ;;  %s716_s0 = inlined_call_operand.vmem [shape: bf16[512,128], index: 0, kind: input, shape index: {}]   ;;  %s717_s1 = inlined_call_operand.vmem [shape: bf16[128,16], index: 1, kind: input, shape index: {}]   ;;  %s718_s2 = inlined_call_operand.vmem [shape: f32[1,16], index: 2, kind: input, shape index: {}]   ;;  %s719_s3 = inlined_call_operand.vmem [shape: f32[512,16], index: 3, kind: output, shape index: {}]  }
   0x1 LB: > { %s480_s13 = sadd.s32 4294967295, %s602_s12   ;;  %p484_p0 = scmp.ge.s32.totalorder %s602_s12, 1  ;;  %s602_s12 = sphi %s624_s12, %s13_s12  }
   0x2   : > { %p138_p1 = scmp.lt.s32.totalorder %s602_s12, 5 }
   0x4   : > { %p139_p2 = pnand %p484_p0, %p138_p1 }
   0x5   : > { %v580_v0 = vld [vmem:[%s717_s1] sm:$0xff] (!%p139_p2)   ;;  %s485_s16 = sshll.u32 (!%p139_p2), %s480_s13, 4  ;;  %v581_v1 = vld [vmem:[%s717_s1 + $0x8] sm:$0xff] (!%p139_p2)   ;;  %v582_v2 = vld [vmem:[%s717_s1 + $0x10] sm:$0xff] (!%p139_p2)   ;;  %vm407_vm0 = vcmask (!%p139_p2), 130048  }
   0x6   : > { %142 = sbr.rel (%p139_p2) target bundleno = 264 (0x108), region = 32  ;;  %p163_p3 = scmp.lt.s32.totalorder (!%p139_p2), %s485_s16, 63  ;;  %524 = vmatprep.subr.bf16.mxu0 (!%p139_p2), %v580_v0  ;;  %556 = vmatprep.subr.bf16.mxu1 (!%p139_p2), %v580_v0  ;;  %v583_v3 = vld [vmem:[%s717_s1 + $0x18] sm:$0xff] (!%p139_p2)   ;;  %v584_v6 = vld [vmem:[%s717_s1 + $0x20] sm:$0xff] (!%p139_p2)   ;;  %v585_v7 = vld [vmem:[%s717_s1 + $0x28] sm:$0xff] (!%p139_p2)  }
   0x7   : > { %525 = vmatpush3.bf16.msra.mxu0 (!%p139_p2), %v580_v0  ;;  %564 = vmatpush3.bf16.msra.mxu1 (!%p139_p2), %v580_v0  ;;  %v586_v8 = vld [vmem:[%s717_s1 + $0x30] sm:$0xff] (!%p139_p2)   ;;  %v587_v9 = vld [vmem:[%s717_s1 + $0x38] sm:$0xff] (!%p139_p2)   ;;  %v489_v16 = vld [vmem:[%s718_s2] ss:$0 sm:$0xff] (!%p139_p2) }
   0x8   : > { %526 = vmatprep.subr.bf16.mxu0 (!%p139_p2), %v581_v1  ;;  %557 = vmatprep.subr.bf16.mxu1 (!%p139_p2), %v581_v1 }
   0xb   : > { %527 = vmatpush3.bf16.msra.mxu0 (!%p139_p2), %v581_v1  ;;  %565 = vmatpush3.bf16.msra.mxu1 (!%p139_p2), %v581_v1 }
   0xc   : > { %528 = vmatprep.subr.bf16.mxu0 (!%p139_p2), %v582_v2  ;;  %558 = vmatprep.subr.bf16.mxu1 (!%p139_p2), %v582_v2 }
   0xd   : > { %s721_s16 = smov (!%p163_p3, %s485_s16), 63 }
   0xe   : > { %s486_s21 = sshll.u32 %s721_s16, 2  ;;  %s488_s8 = sshll.u32 %s721_s16, 3 }
   0xf   : > { %s647_s24 = scalar_lea.vmem %s716_s0, %s486_s21  ;;  %529 = vmatpush3.bf16.msra.mxu0 %v582_v2  ;;  %566 = vmatpush3.bf16.msra.mxu1 %v582_v2  ;;  %s679_s14 = scalar_lea.vmem %s719_s3, %s488_s8 }
  0x10   : > { %v588_v4 = vld [vmem:[%s647_s24] sm:$0xff]   ;;  %530 = vmatprep.subr.bf16.mxu0 %v583_v3  ;;  %559 = vmatprep.subr.bf16.mxu1 %v583_v3  ;;  %v590_v10 = vld [vmem:[%s647_s24 + $0x8] sm:$0xff]   ;;  %v592_v12 = vld [vmem:[%s647_s24 + $0x10] sm:$0xff]  }
  0x11   : > { %v589_v5 = vld [vmem:[%s647_s24 + $0x20] sm:$0xff]   ;;  %540 = vmatprep.mubr.bf16.mxu0 %v588_v4  ;;  %v591_v11 = vld [vmem:[%s647_s24 + $0x28] sm:$0xff]   ;;  %v593_v13 = vld [vmem:[%s647_s24 + $0x30] sm:$0xff]  }
  0x12   : > { %548 = vmatprep.mubr.bf16.mxu1 %v589_v5  ;;  %v594_v14 = vld [vmem:[%s647_s24 + $0x18] sm:$0xff]  }
  0x13   : > { %531 = vmatpush3.bf16.msra.mxu0 %v583_v3  ;;  %567 = vmatpush3.bf16.msra.mxu1 %v583_v3  ;;  %v595_v15 = vld [vmem:[%s647_s24 + $0x38] sm:$0xff]  }
  0x14   : > { %532 = vmatprep.subr.bf16.mxu0 %v584_v6  ;;  %560 = vmatprep.subr.bf16.mxu1 %v584_v6 }
  0x17   : > { %533 = vmatpush3.bf16.msra.mxu0 %v584_v6  ;;  %568 = vmatpush3.bf16.msra.mxu1 %v584_v6 }
  0x18   : > { %534 = vmatprep.subr.bf16.mxu0 %v585_v7  ;;  %561 = vmatprep.subr.bf16.mxu1 %v585_v7 }
  0x1b   : > { %535 = vmatpush3.bf16.msra.mxu0 %v585_v7  ;;  %569 = vmatpush3.bf16.msra.mxu1 %v585_v7 }
  0x1c   : > { %536 = vmatprep.subr.bf16.mxu0 %v586_v8  ;;  %562 = vmatprep.subr.bf16.mxu1 %v586_v8 }
  0x1f   : > { %537 = vmatpush3.bf16.msra.mxu0 %v586_v8  ;;  %570 = vmatpush3.bf16.msra.mxu1 %v586_v8 }
  0x20   : > { %538 = vmatprep.subr.bf16.mxu0 %v587_v9  ;;  %563 = vmatprep.subr.bf16.mxu1 %v587_v9 }
  0x23   : > { %539 = vmatpush3.bf16.msra.mxu0 %v587_v9  ;;  %571 = vmatpush3.bf16.msra.mxu1 %v587_v9 }
  0x26   : > { %541 = vmatmul.mubr.bf16.vlgmr.msra.gmra.mrb[0].mxu0 %v590_v10  ;;  %549 = vmatmul.mubr.bf16.vlgmr.msra.gmra.mrb[0].mxu1 %v591_v11 }
  0x27   : > { %544 = vmatprep.mubr.bf16.mxu0 %v592_v12  ;;  %552 = vmatprep.mubr.bf16.mxu1 %v593_v13 }
  0x2e   : > { %545 = vmatmul.mubr.bf16.gmra.mrb[4].mxu0 %v594_v14  ;;  %553 = vmatmul.mubr.bf16.gmra.mrb[4].mxu1 %v595_v15 }
  0xf9   : > { %v542_v17 = vpop.f32.mrb[0].mxu0  ;;  %v550_v18 = vpop.f32.mrb[0].mxu1 }
  0xfa   : > { %v353_v19 = vadd.f32 %v542_v17, %v489_v16  ;;  %v385_v20 = vadd.f32 %v550_v18, %v489_v16  ;;  %v344_v21 = vpop.f32.mrb[1].mxu0  ;;  %v376_v22 = vpop.f32.mrb[1].mxu1 }
  0xfb   : > { %v345_v23 = vadd.f32 %v489_v16, %v344_v21  ;;  %v377_v24 = vadd.f32 %v489_v16, %v376_v22  ;;  %v543_v25 = vpop.f32.mrb[2].mxu0  ;;  %v551_v26 = vpop.f32.mrb[2].mxu1 }
  0xfc   : > { %410 = vst.msk [vmem:[%s679_s14 + $0x10] sm:$0xff] %vm407_vm0, %v353_v19  ;;  %418 = vst.msk [vmem:[%s679_s14 + $0x50] sm:$0xff] %vm407_vm0, %v385_v20  ;;  %v356_v27 = vadd.f32 %v543_v25, %v489_v16  ;;  %v388_v28 = vadd.f32 %v551_v26, %v489_v16  ;;  %v347_v29 = vpop.f32.mrb[3].mxu0  ;;  %v379_v30 = vpop.f32.mrb[3].mxu1 }
  0xfd   : > { %408 = vst.msk [vmem:[%s679_s14] sm:$0xff] %vm407_vm0, %v345_v23  ;;  %416 = vst.msk [vmem:[%s679_s14 + $0x40] sm:$0xff] %vm407_vm0, %v377_v24  ;;  %v348_v31 = vadd.f32 %v489_v16, %v347_v29  ;;  %v380_v32 = vadd.f32 %v489_v16, %v379_v30 }
  0xfe   : > { %411 = vst.msk [vmem:[%s679_s14 + $0x18] sm:$0xff] %vm407_vm0, %v356_v27  ;;  %419 = vst.msk [vmem:[%s679_s14 + $0x58] sm:$0xff] %vm407_vm0, %v388_v28 }
  0xff   : > { %409 = vst.msk [vmem:[%s679_s14 + $0x8] sm:$0xff] %vm407_vm0, %v348_v31  ;;  %417 = vst.msk [vmem:[%s679_s14 + $0x48] sm:$0xff] %vm407_vm0, %v380_v32 }
 0x101   : > { %v546_v33 = vpop.f32.mrb[4].mxu0  ;;  %v554_v34 = vpop.f32.mrb[4].mxu1 }
 0x102   : > { %v369_v35 = vadd.f32 %v546_v33, %v489_v16  ;;  %v401_v36 = vadd.f32 %v554_v34, %v489_v16  ;;  %v360_v37 = vpop.f32.mrb[5].mxu0  ;;  %v392_v38 = vpop.f32.mrb[5].mxu1 }
 0x103   : > { %v361_v39 = vadd.f32 %v489_v16, %v360_v37  ;;  %v393_v40 = vadd.f32 %v489_v16, %v392_v38  ;;  %v547_v41 = vpop.f32.mrb[6].mxu0  ;;  %v555_v42 = vpop.f32.mrb[6].mxu1 }
 0x104   : > { %414 = vst.msk [vmem:[%s679_s14 + $0x30] sm:$0xff] %vm407_vm0, %v369_v35  ;;  %422 = vst.msk [vmem:[%s679_s14 + $0x70] sm:$0xff] %vm407_vm0, %v401_v36  ;;  %v372_v43 = vadd.f32 %v547_v41, %v489_v16  ;;  %v404_v44 = vadd.f32 %v555_v42, %v489_v16  ;;  %v363_v45 = vpop.f32.mrb[7].mxu0  ;;  %v395_v46 = vpop.f32.mrb[7].mxu1 }
 0x105   : > { %412 = vst.msk [vmem:[%s679_s14 + $0x20] sm:$0xff] %vm407_vm0, %v361_v39  ;;  %420 = vst.msk [vmem:[%s679_s14 + $0x60] sm:$0xff] %vm407_vm0, %v393_v40  ;;  %v364_v47 = vadd.f32 %v489_v16, %v363_v45  ;;  %v396_v48 = vadd.f32 %v489_v16, %v395_v46 }
 0x106   : > { %415 = vst.msk [vmem:[%s679_s14 + $0x38] sm:$0xff] %vm407_vm0, %v372_v43  ;;  %423 = vst.msk [vmem:[%s679_s14 + $0x78] sm:$0xff] %vm407_vm0, %v404_v44 }
 0x107   : > { %413 = vst.msk [vmem:[%s679_s14 + $0x28] sm:$0xff] %vm407_vm0, %v364_v47  ;;  %421 = vst.msk [vmem:[%s679_s14 + $0x68] sm:$0xff] %vm407_vm0, %v396_v48 }
 0x108 PF: > { %s13_s12 = sadd.s32 1, %s602_s12  }
 0x109   : > { %p10_p4 = scmp.ge.s32.totalorder %s13_s12, 6  }
 0x10b   :  { %12 = sbr.rel (!%p10_p4) target bundleno = 1 (0x1), region = 62 }

</bundles_post_ra>
